<compile_context>
chip_gen: v6e
topology: v6e:2x2x1
jax: 0.10.0
libtpu: 0.0.40
codegen_flags: <defaults>
</compile_context>

<pallas_src>
import jax
import jax.numpy as jnp
from jax import lax
from jax.experimental import pallas as pl
from jax.experimental.pallas import tpu as pltpu

F32_MIN = float(jnp.finfo(jnp.float32).min)   # == torch.finfo(torch.float32).min
_VMEM_LIMIT = 32 * 1024 * 1024


def _round_up(x, m):
    return ((x + m - 1) // m) * m


def _cost(flops, nbytes):
    return pl.CostEstimate(flops=int(flops), transcendentals=0,
                           bytes_accessed=int(nbytes))


# ---------------------------------------------------------------------------
# Pallas kernels
# ---------------------------------------------------------------------------
def _linear_relu_kernel(x_ref, w_ref, o_ref):
    # Linear(bias=False) + ReLU (use_norm=False -> BatchNorm is identity).
    o_ref[...] = jnp.maximum(
        jnp.dot(x_ref[...], w_ref[...], preferred_element_type=jnp.float32), 0.0)


def _voxel_stats_kernel(pv_ref, pts1_ref, vs_ref):
    # Grid: (voxel tiles, point tiles); point axis is the reduction ("arbitrary").
    # vs accumulates per-voxel [sum_x, sum_y, sum_z, sum_w, count, 0, 0, 0].
    n = pl.program_id(1)

    @pl.when(n == 0)
    def _():
        vs_ref[...] = jnp.zeros_like(vs_ref)

    vt = vs_ref.shape[0]
    v0 = pl.program_id(0) * vt
    vox = v0 + lax.broadcasted_iota(jnp.int32, (1, vt), 1)            # (1, Vt)
    oh = (pv_ref[...] == vox).astype(jnp.float32)                     # (Nt, Vt)
    # ohT @ [x y z w 1 0 0 0] -> sums + counts in a single MXU matmul.
    vs_ref[...] += lax.dot_general(
        oh, pts1_ref[...], (((0,), (0,)), ((), ())),
        preferred_element_type=jnp.float32)                           # (Vt, 8)


def _scatter_feature_kernel(pv_ref, pts_ref, pf_ref, vs_ref, wa_ref, sf_ref):
    # One point tile: gather voxel stats (one-hot matmul), fused attention FC,
    # elementwise product with the point FC.
    vp = vs_ref.shape[0]
    vox = lax.broadcasted_iota(jnp.int32, (1, vp), 1)                 # (1, Vp)
    oh = (pv_ref[...] == vox).astype(jnp.float32)                     # (Nt, Vp)
    stats = jnp.dot(oh, vs_ref[...], preferred_element_type=jnp.float32)  # (Nt, 8)
    cnt = jnp.maximum(stats[:, 4:5], 1.0)
    pmean = stats[:, :4] / cnt                                        # scatterMean gather
    # cat(p_xyz - m_xyz, p_w, m) @ W  ==  [p | m] @ W_fused  (wa_ref pre-folded)
    att_in = jnp.concatenate([pts_ref[...], pmean], axis=1)           # (Nt, 8)
    af = jnp.maximum(
        jnp.dot(att_in, wa_ref[...], preferred_element_type=jnp.float32), 0.0)
    sf_ref[...] = pf_ref[...] * af


def _scatter_max_kernel(pv_ref, sf_ref, vf_ref):
    # Grid: (voxel tiles, point tiles).  Running max in the resident (Vt, C)
    # output block; masked intermediate is only (8, Vt, C) per inner chunk.
    n = pl.program_id(1)

    @pl.when(n == 0)
    def _():
        vf_ref[...] = jnp.full_like(vf_ref, F32_MIN)   # empty voxels keep f32-min

    vt = vf_ref.shape[0]
    v0 = pl.program_id(0) * vt
    vox = v0 + lax.broadcasted_iota(jnp.int32, (1, vt), 1)            # (1, Vt)
    nt = sf_ref.shape[0]
    nc = 8                                                            # points / chunk

    def body(c, carry):
        i = pl.multiple_of(c * nc, nc)
        oh_c = pv_ref[pl.ds(i, nc), :] == vox                         # (nc, Vt) bool
        sf_c = sf_ref[pl.ds(i, nc), :]                                # (nc, C)
        masked = jnp.where(oh_c[:, :, None], sf_c[:, None, :], F32_MIN)
        vf_ref[...] = jnp.maximum(vf_ref[...], jnp.max(masked, axis=0))
        return carry

    lax.fori_loop(0, nt // nc, body, 0)


def _gather_concat_kernel(pv_ref, sf_ref, vf_ref, out_ref):
    # out = [scatter_feature | voxel_feature[pv]] -> (Nt, 2C) lane-dense store.
    vp = vf_ref.shape[0]
    vox = lax.broadcasted_iota(jnp.int32, (1, vp), 1)
    oh = (pv_ref[...] == vox).astype(jnp.float32)                     # (Nt, Vp)
    pvf = jnp.dot(oh, vf_ref[...], preferred_element_type=jnp.float32)
    out_ref[...] = jnp.concatenate([sf_ref[...], pvf], axis=1)


# ---------------------------------------------------------------------------
# pallas_call wrappers
# ---------------------------------------------------------------------------
def _linear_relu(x, w, nt):
    n, k = x.shape
    c = w.shape[1]
    return pl.pallas_call(
        _linear_relu_kernel,
        out_shape=jax.ShapeDtypeStruct((n, c), jnp.float32),
        grid=(n // nt,),
        in_specs=[pl.BlockSpec((nt, k), lambda i: (i, 0)),
                  pl.BlockSpec((k, c), lambda i: (0, 0))],
        out_specs=pl.BlockSpec((nt, c), lambda i: (i, 0)),
        compiler_params=pltpu.CompilerParams(
            dimension_semantics=("parallel",), vmem_limit_bytes=_VMEM_LIMIT),
        cost_estimate=_cost(2 * n * k * c, 4 * (n * k + k * c + n * c)),
    )(x, w)


def _voxel_stats(pv2, pts1, vp, vt, nt):
    n = pts1.shape[0]
    gv, gn = vp // vt, n // nt
    return pl.pallas_call(
        _voxel_stats_kernel,
        out_shape=jax.ShapeDtypeStruct((vp, 8), jnp.float32),
        grid=(gv, gn),
        in_specs=[pl.BlockSpec((nt, 1), lambda v, i: (i, 0)),
                  pl.BlockSpec((nt, 8), lambda v, i: (i, 0))],
        out_specs=pl.BlockSpec((vt, 8), lambda v, i: (v, 0)),
        compiler_params=pltpu.CompilerParams(
            dimension_semantics=("parallel", "arbitrary"),
            vmem_limit_bytes=_VMEM_LIMIT),
        cost_estimate=_cost(2 * n * vp * 8, 4 * (gv * n * 9 + vp * 8)),
    )(pv2, pts1)


def _scatter_feature(pv2, pts, pf, vstats, wa, nt):
    n, c = pf.shape
    vp = vstats.shape[0]
    return pl.pallas_call(
        _scatter_feature_kernel,
        out_shape=jax.ShapeDtypeStruct((n, c), jnp.float32),
        grid=(n // nt,),
        in_specs=[pl.BlockSpec((nt, 1), lambda i: (i, 0)),
                  pl.BlockSpec((nt, 4), lambda i: (i, 0)),
                  pl.BlockSpec((nt, c), lambda i: (i, 0)),
                  pl.BlockSpec((vp, 8), lambda i: (0, 0)),
                  pl.BlockSpec((8, c), lambda i: (0, 0))],
        out_specs=pl.BlockSpec((nt, c), lambda i: (i, 0)),
        compiler_params=pltpu.CompilerParams(
            dimension_semantics=("parallel",), vmem_limit_bytes=_VMEM_LIMIT),
        cost_estimate=_cost(2 * n * (vp * 8 + 8 * c),
                            4 * (n * (5 + 2 * c) + vp * 8 + 8 * c)),
    )(pv2, pts, pf, vstats, wa)


def _scatter_max(pv2, sf, vp, vt, nt):
    n, c = sf.shape
    gv, gn = vp // vt, n // nt
    return pl.pallas_call(
        _scatter_max_kernel,
        out_shape=jax.ShapeDtypeStruct((vp, c), jnp.float32),
        grid=(gv, gn),
        in_specs=[pl.BlockSpec((nt, 1), lambda v, i: (i, 0)),
                  pl.BlockSpec((nt, c), lambda v, i: (i, 0))],
        out_specs=pl.BlockSpec((vt, c), lambda v, i: (v, 0)),
        compiler_params=pltpu.CompilerParams(
            dimension_semantics=("parallel", "arbitrary"),
            vmem_limit_bytes=_VMEM_LIMIT),
        cost_estimate=_cost(n * vp * c, 4 * (gv * n * (c + 1) + vp * c)),
    )(pv2, sf)


def _gather_concat(pv2, sf, vf, nt):
    n, c = sf.shape
    vp = vf.shape[0]
    return pl.pallas_call(
        _gather_concat_kernel,
        out_shape=jax.ShapeDtypeStruct((n, 2 * c), jnp.float32),
        grid=(n // nt,),
        in_specs=[pl.BlockSpec((nt, 1), lambda i: (i, 0)),
                  pl.BlockSpec((nt, c), lambda i: (i, 0)),
                  pl.BlockSpec((vp, c), lambda i: (0, 0))],
        out_specs=pl.BlockSpec((nt, 2 * c), lambda i: (i, 0)),
        compiler_params=pltpu.CompilerParams(
            dimension_semantics=("parallel",), vmem_limit_bytes=_VMEM_LIMIT),
        cost_estimate=_cost(2 * n * vp * c, 4 * (n * (1 + 3 * c) + vp * c)),
    )(pv2, sf, vf)


# ---------------------------------------------------------------------------
# Glue (padding, attention-weight folding, dense BEV scatter)
# ---------------------------------------------------------------------------
def _fused_attention_weight(w_att):
    # attention input = cat(p_xyz - m_xyz, p_w, m)  ==  [p | m] @ W_fused
    wa_p = w_att[:4]
    wa_m = w_att[4:8].at[:3].add(-w_att[:3])
    return jnp.concatenate([wa_p, wa_m], axis=0)                      # (8, C)


def _pad_points(points, nt_max):
    n = points.shape[0]
    np_ = _round_up(n, 8)
    if np_ > nt_max:
        np_ = _round_up(np_, nt_max)
    nt = min(np_, nt_max)
    pts = jnp.zeros((np_, 4), jnp.float32).at[:n].set(points)
    return pts, np_, nt


def _pad_pv(pv, np_):
    n = pv.shape[0]
    # padded points get -1 -> never match the in-kernel one-hot compare
    return jnp.full((np_, 1), -1, jnp.int32).at[:n, 0].set(pv.astype(jnp.int32))


def _pad_voxels(v, vt_max):
    vp = _round_up(v, 8)
    if vp > vt_max:
        vp = _round_up(vp, vt_max)
    return vp, min(vp, vt_max)


def _dense_nchw(batch_size, spatial_shape, feature_dim, indices, features):
    # torch dense(..., channels_first=True) == scatter_nd into (B,H,W,C), then NCHW.
    h, w = spatial_shape
    grid = jnp.zeros((batch_size, h, w, feature_dim), dtype=features.dtype)
    grid = grid.at[indices[:, 0], indices[:, 1], indices[:, 2]].set(features)
    return jnp.transpose(grid, (0, 3, 1, 2))


class HVFeatureNet:
    def __init__(self, bev_sizes, use_norm=False, input_scale_nums=3,
                 attention_knowledge_dim=8, AVFE_feature_dim=64,
                 AVFEO_feature_dim=128, key=None, point_tile=128, voxel_tile=128):
        self.bev_sizes = bev_sizes
        self.input_scale_nums = input_scale_nums
        self.output_scale_nums = len(bev_sizes) - input_scale_nums
        self.AVFE_feature_dim = AVFE_feature_dim
        self.AVFEO_feature_dim = AVFEO_feature_dim
        self.point_tile = point_tile
        self.voxel_tile = voxel_tile
        # use_norm=False -> BatchNorm is identity; Linear layers have bias=False.
        if key is None:
            key = jax.random.PRNGKey(42)
        k1, k2, k3, k4 = jax.random.split(key, 4)
        s = 0.1
        self.w_avfe_point = s * jax.random.normal(k1, (4, AVFE_feature_dim), jnp.float32)
        self.w_avfe_att = s * jax.random.normal(
            k2, (attention_knowledge_dim, AVFE_feature_dim), jnp.float32)
        avfeo_in = input_scale_nums * 2 * AVFE_feature_dim
        self.w_avfeo_point = s * jax.random.normal(
            k3, (avfeo_in, AVFEO_feature_dim), jnp.float32)
        self.w_avfeo_att = s * jax.random.normal(
            k4, (attention_knowledge_dim, AVFEO_feature_dim), jnp.float32)

    def __call__(self, input_dict):
        batch_size = input_dict["batch_size"]
        points = input_dict["bev_points"].astype(jnp.float32)
        pvs = input_dict["bev_mapping_pvs"]
        vfs = input_dict["bev_mapping_vfs"]

        pts, np_, nt = _pad_points(points, self.point_tile)
        # [x y z w 1 0 0 0] -> counts come for free out of the scatter-sum matmul
        pts1 = jnp.zeros((np_, 8), jnp.float32).at[:, :4].set(pts).at[:, 4].set(1.0)

        wa_avfe = _fused_attention_weight(self.w_avfe_att)
        wa_avfeo = _fused_attention_weight(self.w_avfeo_att)

        # Hoisted: identical across the 3 AVFE scales in the reference.
        pf_avfe = _linear_relu(pts, self.w_avfe_point, nt)            # (Np, 64)

        avfe_feats = []
        for i in range(self.input_scale_nums):
            v_real = vfs[i].shape[0]
            vp, vt = _pad_voxels(v_real, self.voxel_tile)
            pv2 = _pad_pv(pvs[i], np_)
            vstats = _voxel_stats(pv2, pts1, vp, vt, nt)              # (Vp, 8)
            sf = _scatter_feature(pv2, pts, pf_avfe, vstats, wa_avfe, nt)
            vf = _scatter_max(pv2, sf, vp, vt, nt)                    # (Vp, 64)
            avfe_feats.append(_gather_concat(pv2, sf, vf, nt))        # (Np, 128)
        final_avfe = jnp.concatenate(avfe_feats, axis=1)              # (Np, 384)

        # Hoisted: identical across output scales in the reference.
        pf_avfeo = _linear_relu(final_avfe, self.w_avfeo_point, nt)   # (Np, 128)

        outputs = []
        for i in range(self.input_scale_nums,
                       self.input_scale_nums + self.output_scale_nums):
            v_real = vfs[i].shape[0]
            vp, vt = _pad_voxels(v_real, self.voxel_tile)
            pv2 = _pad_pv(pvs[i], np_)
            vstats = _voxel_stats(pv2, pts1, vp, vt, nt)
            sf = _scatter_feature(pv2, pts, pf_avfeo, vstats, wa_avfeo, nt)
            vf = _scatter_max(pv2, sf, vp, vt, nt)                    # (Vp, 128)
            outputs.append(_dense_nchw(batch_size, self.bev_sizes[i],
                                       self.AVFEO_feature_dim, vfs[i],
                                       vf[:v_real]))
        return outputs


# ---------------------------------------------------------------------------
# Demo
# ---------------------------------------------------------------------------
if __name__ == "__main__":
    key = jax.random.PRNGKey(0)
    kp, *kperm = jax.random.split(key, 6)

    batch_size = 2
    num_points = 320
    bev_sizes = [(16, 16), (8, 8), (4, 4), (8, 8)]   # 3 input scales + 1 output scale
    voxel_counts = [160, 48, 24, 48]

    points = jax.random.normal(kp, (num_points, 4), dtype=jnp.float32)

    bev_mapping_pvs = []
    bev_mapping_vfs = []
    for s, (hw, v) in enumerate(zip(bev_sizes, voxel_counts)):
        pv = jnp.arange(num_points, dtype=jnp.int32) % v
        pv = jax.random.permutation(kperm[s], pv)
        bev_mapping_pvs.append(pv.astype(jnp.int32))
        h, w = hw
        flat = jnp.arange(v, dtype=jnp.int32)
        b = flat % batch_size
        cell = flat // batch_size
        y = cell // w
        x = cell % w
        bev_mapping_vfs.append(jnp.stack([b, y, x], axis=1).astype(jnp.int32))

    net = HVFeatureNet(bev_sizes)
    input_dict = {
        "batch_size": batch_size,
        "bev_points": points,
        "bev_mapping_pvs": bev_mapping_pvs,
        "bev_mapping_vfs": bev_mapping_vfs,
    }

    outs = net(input_dict)
    for o in outs:
        jax.block_until_ready(o)
    assert outs[0].shape == (batch_size, 128, 8, 8)
    print("KERNEL_OK")
</pallas_src>

<mosaic_0001>
module attributes {stable_mosaic.version = 11 : i64} {
  func.func @_linear_relu_kernel(%arg0: i32, %arg1: memref<128x4xf32, #tpu.memory_space<vmem>>, %arg2: memref<4x64xf32, #tpu.memory_space<vmem>>, %arg3: memref<128x64xf32, #tpu.memory_space<vmem>>) attributes {dimension_semantics = [#tpu.dimension_semantics<parallel>], iteration_bounds = array<i64: 3>, scalar_prefetch = 0 : i64, scratch_operands = 0 : i64, tpu.core_type = #tpu.core_type<tc>, window_params = [{transform_indices = @transform_0, window_bounds = array<i64: 128, 4>}, {pipeline_mode = #tpu.pipeline_mode<synchronous>, transform_indices = @transform_1, window_bounds = array<i64: 4, 64>}, {transform_indices = @transform_2, window_bounds = array<i64: 128, 64>}]} {
    %c0 = arith.constant 0 : index
    %c0_0 = arith.constant 0 : index
    %0 = vector.load %arg1[%c0, %c0_0] : memref<128x4xf32, #tpu.memory_space<vmem>>, vector<128x4xf32>
    %c0_1 = arith.constant 0 : index
    %c0_2 = arith.constant 0 : index
    %1 = vector.load %arg2[%c0_1, %c0_2] : memref<4x64xf32, #tpu.memory_space<vmem>>, vector<4x64xf32>
    %cst = arith.constant dense<0.000000e+00> : vector<128x64xf32>
    %2 = tpu.matmul %0, %1, %cst {dimension_numbers = #tpu.dot_dimension_numbers<[1], [0], [0], [1], [0, 0, 1, 1], [], []>} : vector<128x4xf32>, vector<4x64xf32>, vector<128x64xf32> -> vector<128x64xf32>
    %cst_3 = arith.constant 0.000000e+00 : f32
    %3 = vector.broadcast %cst_3 : f32 to vector<128x64xf32>
    %4 = arith.maximumf %2, %3 : vector<128x64xf32>
    %c0_4 = arith.constant 0 : index
    %c0_5 = arith.constant 0 : index
    %5 = vector.load %arg3[%c0_4, %c0_5] : memref<128x64xf32, #tpu.memory_space<vmem>>, vector<128x64xf32>
    tpu.vector_store %arg3[%c0_4, %c0_5], %4 {strides = array<i32>} : memref<128x64xf32, #tpu.memory_space<vmem>>, vector<128x64xf32>,
    return
  }
  func.func @transform_0(%arg0: i32) -> (i32, i32) {
    %c0_i32 = arith.constant 0 : i32
    %c0_i32_0 = arith.constant 0 : i32
    return %arg0, %c0_i32 : i32, i32
  }
  func.func @transform_1(%arg0: i32) -> (i32, i32) {
    %c0_i32 = arith.constant 0 : i32
    %c0_i32_0 = arith.constant 0 : i32
    %c0_i32_1 = arith.constant 0 : i32
    return %c0_i32, %c0_i32_0 : i32, i32
  }
  func.func @transform_2(%arg0: i32) -> (i32, i32) {
    %c0_i32 = arith.constant 0 : i32
    %c0_i32_0 = arith.constant 0 : i32
    return %arg0, %c0_i32 : i32, i32
  }
}

</mosaic_0001>

<bundles_post_ra>
// kernel: tpu_custom_call.1
= control target key start
LH: loop header
LB: loop body
LE: loop exit
PB: predicated region body
PF: predicated region fallthrough
CT: control target
= control target key end

     0   :  { %s555_s9 = smov 0   ;;  %s632_s0 = inlined_call_operand.vmem [shape: f32[384,4], index: 0, kind: input, shape index: {}]   ;;  %s633_s1 = inlined_call_operand.vmem [shape: f32[4,64], index: 1, kind: input, shape index: {}]   ;;  %s634_s2 = inlined_call_operand.vmem [shape: f32[384,64], index: 2, kind: output, shape index: {}]  }
   0x1 LB: > { %s451_s10 = sadd.s32 4294967295, %s538_s9   ;;  %p455_p0 = scmp.ge.s32.totalorder %s538_s9, 1  ;;  %s538_s9 = sphi %s555_s9, %s12_s9  }
   0x2   : > { %p113_p1 = scmp.lt.s32.totalorder %s538_s9, 4 }
   0x4   : > { %p114_p2 = pnand %p455_p0, %p113_p1 }
   0x5   : > { %s456_s13 = sshll.u32 (!%p114_p2), %s451_s10, 4 }
   0x6   : > { %117 = sbr.rel (%p114_p2) target bundleno = 227 (0xe3), region = 28  ;;  %p136_p3 = scmp.lt.s32.totalorder (!%p114_p2), %s456_s13, 47 }
   0xb   : > { %v163_v0 = vld [vmem:[%s633_s1] sm:$0xf]  ;;  %vm213_vm0 = vcmask 1043456   ;;  %s636_s13 = smov (!%p136_p3, %s456_s13), 47  ;;  %vm164_vm1 = vcmask 31744   ;;  %vm378_vm2 = vcmask 523264  }
   0xc   : > { %496 = vmatprep.subr.msk.mxu0 %vm213_vm0, %v163_v0  ;;  %522 = vmatprep.subr.msk.mxu1 %vm213_vm0, %v163_v0  ;;  %s457_s14 = sshll.u32 %s636_s13, 3 }
   0xd   : > { %497 = vmatpush3.msk.msra.mxu0 %vm213_vm0, %v163_v0  ;;  %523 = vmatpush3.msk.msra.mxu1 %vm213_vm0, %v163_v0  ;;  %s139_s17 = scalar_lea.vmem %s632_s0, %s457_s14  ;;  %s595_s20 = scalar_lea.vmem %s634_s2, %s457_s14 }
   0xe   : > { %v147_v1 = vld [vmem:[%s139_s17] sm:$0xff]  ;;  %v148_v3 = vld [vmem:[%s139_s17 + $0x8] sm:$0xff]  ;;  %v149_v5 = vld [vmem:[%s139_s17 + $0x10] sm:$0xff] }
   0xf   : > { %v155_v2 = vld [vmem:[%s139_s17 + $0x40] sm:$0xff]  ;;  %498 = vmatprep.mubr.msk.f32.mxu0 %vm164_vm1, %v147_v1  ;;  %v156_v4 = vld [vmem:[%s139_s17 + $0x48] sm:$0xff]  ;;  %v157_v6 = vld [vmem:[%s139_s17 + $0x50] sm:$0xff] }
  0x10   : > { %510 = vmatprep.mubr.msk.f32.mxu1 %vm164_vm1, %v155_v2  ;;  %499 = vmatmul.mubr.msk.f32.vlgmr.msra.gmra.mxu0 %vm164_vm1, %v148_v3  ;;  %v150_v7 = vld [vmem:[%s139_s17 + $0x18] sm:$0xff]  ;;  %v151_v9 = vld [vmem:[%s139_s17 + $0x20] sm:$0xff]  ;;  %v152_v11 = vld [vmem:[%s139_s17 + $0x28] sm:$0xff] }
  0x11   : > { %511 = vmatmul.mubr.msk.f32.vlgmr.msra.gmra.mxu1 %vm164_vm1, %v156_v4  ;;  %501 = vmatprep.mubr.msk.f32.mxu0 %vm164_vm1, %v149_v5  ;;  %v158_v8 = vld [vmem:[%s139_s17 + $0x58] sm:$0xff]  ;;  %v159_v10 = vld [vmem:[%s139_s17 + $0x60] sm:$0xff]  ;;  %v160_v12 = vld [vmem:[%s139_s17 + $0x68] sm:$0xff] }
  0x12   : > { %513 = vmatprep.mubr.msk.f32.mxu1 %vm164_vm1, %v157_v6  ;;  %v153_v13 = vld [vmem:[%s139_s17 + $0x30] sm:$0xff]  ;;  %v154_v15 = vld [vmem:[%s139_s17 + $0x38] sm:$0xff] }
  0x13   : > { %v161_v14 = vld [vmem:[%s139_s17 + $0x70] sm:$0xff]  ;;  %v162_v16 = vld [vmem:[%s139_s17 + $0x78] sm:$0xff] }
  0x14   : > { %502 = vmatmul.mubr.msk.f32.gmra.mxu0 %vm164_vm1, %v150_v7 }
  0x15   : > { %514 = vmatmul.mubr.msk.f32.gmra.mxu1 %vm164_vm1, %v158_v8  ;;  %504 = vmatprep.mubr.msk.f32.mxu0 %vm164_vm1, %v151_v9 }
  0x16   : > { %516 = vmatprep.mubr.msk.f32.mxu1 %vm164_vm1, %v159_v10 }
  0x18   : > { %505 = vmatmul.mubr.msk.f32.gmra.mxu0 %vm164_vm1, %v152_v11 }
  0x19   : > { %517 = vmatmul.mubr.msk.f32.gmra.mxu1 %vm164_vm1, %v160_v12  ;;  %507 = vmatprep.mubr.msk.f32.mxu0 %vm164_vm1, %v153_v13 }
  0x1a   : > { %519 = vmatprep.mubr.msk.f32.mxu1 %vm164_vm1, %v161_v14 }
  0x1c   : > { %508 = vmatmul.mubr.msk.f32.gmra.mxu0 %vm164_vm1, %v154_v15 }
  0x1d   : > { %520 = vmatmul.mubr.msk.f32.gmra.mxu1 %vm164_vm1, %v162_v16 }
  0xd0   : > { %v500_v17 = vpop.f32.mrf.mxu0 }
  0xd1   : > { %v512_v18 = vpop.f32.mrf.mxu1  ;;  %v363_v19 = vmax.f32 %v500_v17, 0.0 }
  0xd2   : > { %v371_v20 = vmax.f32 %v512_v18, 0.0  ;;  %v283_v21 = vpop.f32.mrf.mxu0 }
  0xd3   : > { %v323_v22 = vpop.f32.mrf.mxu1  ;;  %380 = vst.msk [vmem:[%s595_s20 + $0x8] sm:$0xff] %vm378_vm2, %v363_v19  ;;  %v362_v23 = vmax.f32 %v283_v21, 0.0 }
  0xd4   : > { %388 = vst.msk [vmem:[%s595_s20 + $0x48] sm:$0xff] %vm378_vm2, %v371_v20  ;;  %v370_v24 = vmax.f32 %v323_v22, 0.0  ;;  %v503_v25 = vpop.f32.mrf.mxu0 }
  0xd5   : > { %v515_v26 = vpop.f32.mrf.mxu1  ;;  %379 = vst.msk [vmem:[%s595_s20] sm:$0xff] %vm378_vm2, %v362_v23  ;;  %v365_v27 = vmax.f32 %v503_v25, 0.0 }
  0xd6   : > { %387 = vst.msk [vmem:[%s595_s20 + $0x40] sm:$0xff] %vm378_vm2, %v370_v24  ;;  %v373_v28 = vmax.f32 %v515_v26, 0.0  ;;  %v293_v29 = vpop.f32.mrf.mxu0 }
  0xd7   : > { %v333_v30 = vpop.f32.mrf.mxu1  ;;  %382 = vst.msk [vmem:[%s595_s20 + $0x18] sm:$0xff] %vm378_vm2, %v365_v27  ;;  %v364_v31 = vmax.f32 %v293_v29, 0.0 }
  0xd8   : > { %390 = vst.msk [vmem:[%s595_s20 + $0x58] sm:$0xff] %vm378_vm2, %v373_v28  ;;  %v372_v32 = vmax.f32 %v333_v30, 0.0  ;;  %v506_v33 = vpop.f32.mrf.mxu0 }
  0xd9   : > { %v518_v34 = vpop.f32.mrf.mxu1  ;;  %381 = vst.msk [vmem:[%s595_s20 + $0x10] sm:$0xff] %vm378_vm2, %v364_v31  ;;  %v367_v35 = vmax.f32 %v506_v33, 0.0 }
  0xda   : > { %389 = vst.msk [vmem:[%s595_s20 + $0x50] sm:$0xff] %vm378_vm2, %v372_v32  ;;  %v375_v36 = vmax.f32 %v518_v34, 0.0  ;;  %v303_v37 = vpop.f32.mrf.mxu0 }
  0xdb   : > { %v343_v38 = vpop.f32.mrf.mxu1  ;;  %384 = vst.msk [vmem:[%s595_s20 + $0x28] sm:$0xff] %vm378_vm2, %v367_v35  ;;  %v366_v39 = vmax.f32 %v303_v37, 0.0 }
  0xdc   : > { %392 = vst.msk [vmem:[%s595_s20 + $0x68] sm:$0xff] %vm378_vm2, %v375_v36  ;;  %v374_v40 = vmax.f32 %v343_v38, 0.0  ;;  %v509_v41 = vpop.f32.mrf.mxu0 }
  0xdd   : > { %v521_v42 = vpop.f32.mrf.mxu1  ;;  %383 = vst.msk [vmem:[%s595_s20 + $0x20] sm:$0xff] %vm378_vm2, %v366_v39  ;;  %v369_v43 = vmax.f32 %v509_v41, 0.0 }
  0xde   : > { %391 = vst.msk [vmem:[%s595_s20 + $0x60] sm:$0xff] %vm378_vm2, %v374_v40  ;;  %v377_v44 = vmax.f32 %v521_v42, 0.0  ;;  %v313_v45 = vpop.f32.mrf.mxu0 }
  0xdf   : > { %v353_v46 = vpop.f32.mrf.mxu1  ;;  %386 = vst.msk [vmem:[%s595_s20 + $0x38] sm:$0xff] %vm378_vm2, %v369_v43  ;;  %v368_v47 = vmax.f32 %v313_v45, 0.0 }
  0xe0   : > { %394 = vst.msk [vmem:[%s595_s20 + $0x78] sm:$0xff] %vm378_vm2, %v377_v44  ;;  %v376_v48 = vmax.f32 %v353_v46, 0.0 }
  0xe1   : > { %385 = vst.msk [vmem:[%s595_s20 + $0x30] sm:$0xff] %vm378_vm2, %v368_v47 }
  0xe2   : > { %393 = vst.msk [vmem:[%s595_s20 + $0x70] sm:$0xff] %vm378_vm2, %v376_v48 }
  0xe3 PF: > { %s12_s9 = sadd.s32 1, %s538_s9  }
  0xe4   : > { %p9_p4 = scmp.ge.s32.totalorder %s12_s9, 5  }
  0xe6   :  { %11 = sbr.rel (!%p9_p4) target bundleno = 1 (0x1), region = 58 }

</bundles_post_ra>
